<compile_context>
chip_gen: v7x
topology: tpu7x:2x2x1
jax: 0.10.0
libtpu: 0.0.40
codegen_flags: <defaults>
</compile_context>

<pallas_src>
import jax
import jax.numpy as jnp
from jax.experimental import pallas as pl
from jax.experimental.pallas import tpu as pltpu


def _round_up(n: int, m: int) -> int:
    return ((n + m - 1) // m) * m


# ----------------------------------------------------------------------------
# Kernel
# ----------------------------------------------------------------------------
def highway_kernel(x_ref, w_ref, b_ref, o_ref):
    """One row tile of a Highway layer.

    x_ref: (TILE_B, Dp)    input rows (streamed tile)
    w_ref: (Dp, 2*Dp)      fused [W_H | W_T] weights (resident across grid)
    b_ref: (1, 2*Dp)       fused [b_H | b_T] biases  (resident across grid)
    o_ref: (TILE_B, Dp)    output rows
    """
    d = o_ref.shape[-1]
    x = x_ref[...]

    # Single fused MXU matmul for both gates: (TILE_B, Dp) @ (Dp, 2*Dp).
    y = jnp.dot(x, w_ref[...], preferred_element_type=jnp.float32) + b_ref[...]

    h = jnp.maximum(y[:, :d], 0.0)      # relu gate      (VPU)
    t = jax.nn.sigmoid(y[:, d:])        # transform gate (EUP)

    xf = x.astype(jnp.float32)
    # h*t + x*(1-t)  ==  x + t*(h - x)  -> one fewer elementwise op.
    o_ref[...] = (xf + t * (h - xf)).astype(o_ref.dtype)


# ----------------------------------------------------------------------------
# One-time parameter preparation (outside the hot path)
# ----------------------------------------------------------------------------
def prepare_highway_params(w_h, b_h, w_t, b_t):
    """Transpose, fuse and pad the Highway parameters once.

    w_h / w_t are in PyTorch nn.Linear layout (out, in). Returns
    (w_fused, b_fused, d_out) with w_fused: (Dp, 2*Dp), b_fused: (1, 2*Dp)
    where Dp = round_up(D, 128) so the in-kernel H/T split is lane-aligned.
    """
    d_out, d_in = w_h.shape
    assert d_in == d_out, "Highway residual requires in_size == out_size"
    dp = _round_up(d_out, 128)

    pad2 = ((0, dp - d_in), (0, dp - d_out))
    wh_t = jnp.pad(jnp.asarray(w_h, jnp.float32).T, pad2)
    wt_t = jnp.pad(jnp.asarray(w_t, jnp.float32).T, pad2)
    w_fused = jnp.concatenate([wh_t, wt_t], axis=1)            # (Dp, 2*Dp)

    bh = jnp.pad(jnp.asarray(b_h, jnp.float32), (0, dp - d_out))
    bt = jnp.pad(jnp.asarray(b_t, jnp.float32), (0, dp - d_out))
    b_fused = jnp.concatenate([bh, bt]).reshape(1, 2 * dp)     # (1, 2*Dp)

    return w_fused, b_fused, d_out


# ----------------------------------------------------------------------------
# Wrapper
# ----------------------------------------------------------------------------
def highway(x, w_fused, b_fused, d_out, *, tile_b_max=512):
    """Apply one Highway layer.

    x: (B, D) rows. For (batch, time, D) inputs, flatten to (batch*time, D)
    before calling so the row grid is large and the last dim is lane-dense.
    """
    b, d = x.shape
    dp = w_fused.shape[0]
    assert d == d_out and w_fused.shape == (dp, 2 * dp)
    assert b_fused.shape == (1, 2 * dp)

    # Row tile: biggest power-of-8-aligned tile up to tile_b_max.
    tile_b = min(tile_b_max, _round_up(b, 8))
    bp = _round_up(b, tile_b)

    xp = x
    if (bp, dp) != (b, d):
        xp = jnp.pad(x, ((0, bp - b), (0, dp - d)))

    grid = (bp // tile_b,)

    itemsize = jnp.dtype(x.dtype).itemsize
    cost = pl.CostEstimate(
        flops=2 * bp * dp * (2 * dp) + 5 * bp * dp,
        transcendentals=bp * dp,
        bytes_accessed=(xp.size + bp * dp) * itemsize
        + (w_fused.size + b_fused.size) * 4,
    )

    out = pl.pallas_call(
        highway_kernel,
        out_shape=jax.ShapeDtypeStruct((bp, dp), x.dtype),
        grid_spec=pltpu.PrefetchScalarGridSpec(
            num_scalar_prefetch=0,
            grid=grid,
            in_specs=[
                pl.BlockSpec((tile_b, dp), lambda i: (i, 0)),   # x: streamed
                pl.BlockSpec((dp, 2 * dp), lambda i: (0, 0)),   # fused W: resident
                pl.BlockSpec((1, 2 * dp), lambda i: (0, 0)),    # fused b: resident
            ],
            out_specs=pl.BlockSpec((tile_b, dp), lambda i: (i, 0)),
        ),
        compiler_params=pltpu.CompilerParams(
            dimension_semantics=("parallel",),                  # megacore on v7x
        ),
        cost_estimate=cost,
    )(xp, w_fused, b_fused)

    if (bp, dp) != (b, d):
        out = out[:b, :d]
    return out


# ----------------------------------------------------------------------------
# Pure-JAX reference (PyTorch semantics)
# ----------------------------------------------------------------------------
def highway_ref(x, w_h, b_h, w_t, b_t):
    h = jnp.maximum(x @ w_h.T + b_h, 0.0)
    t = jax.nn.sigmoid(x @ w_t.T + b_t)
    return h * t + x * (1.0 - t)


if __name__ == "__main__":
    # CBHG highway width: in_dim (projections=[128, 128] -> highway dim 128).
    in_dim = 128
    batch, seq = 2, 8
    n_highways = 4  # CBHG uses a stack of 4 Highway layers

    key = jax.random.PRNGKey(0)
    keys = jax.random.split(key, 1 + 2 * n_highways)
    kx = keys[0]

    # nn.Linear default init U[-1/sqrt(in), 1/sqrt(in)] with the module's
    # explicit bias overrides: H.bias = 0, T.bias = -1.
    bound = 1.0 / (in_dim ** 0.5)
    layers = []
    for li in range(n_highways):
        kh, kt = keys[1 + 2 * li], keys[2 + 2 * li]
        w_h = jax.random.uniform(kh, (in_dim, in_dim), jnp.float32, -bound, bound)
        w_t = jax.random.uniform(kt, (in_dim, in_dim), jnp.float32, -bound, bound)
        b_h = jnp.zeros((in_dim,), jnp.float32)
        b_t = jnp.full((in_dim,), -1.0, jnp.float32)
        layers.append((w_h, b_h, w_t, b_t))

    # One-time parameter prep (transpose + fuse + pad) outside the hot path.
    fused = [prepare_highway_params(*p) for p in layers]

    # (batch, time, D) -> lane-dense (batch*time, D) rows.
    x3 = jax.random.normal(kx, (batch, seq, in_dim), jnp.float32)
    x = x3.reshape(batch * seq, in_dim)

    out = x
    for (w_fused, b_fused, d_out) in fused:
        out = highway(out, w_fused, b_fused, d_out)
    out = jax.block_until_ready(out)

    ref = x
    for (w_h, b_h, w_t, b_t) in layers:
        ref = highway_ref(ref, w_h, b_h, w_t, b_t)

    assert out.shape == (batch * seq, in_dim)
    assert jnp.allclose(out, ref, atol=1e-5, rtol=1e-5)
    assert out.reshape(batch, seq, in_dim).shape == (batch, seq, in_dim)

    print("KERNEL_OK")
</pallas_src>

<mosaic_0001>
module attributes {stable_mosaic.version = 11 : i64} {
  func.func @highway_kernel(%arg0: i32, %arg1: memref<16x128xf32, #tpu.memory_space<vmem>>, %arg2: memref<128x256xf32, #tpu.memory_space<vmem>>, %arg3: memref<1x256xf32, #tpu.memory_space<vmem>>, %arg4: memref<16x128xf32, #tpu.memory_space<vmem>>) attributes {dimension_semantics = [#tpu.dimension_semantics<parallel>], iteration_bounds = array<i64: 1>, scalar_prefetch = 0 : i64, scratch_operands = 0 : i64, tpu.core_type = #tpu.core_type<tc>, window_params = [{transform_indices = @transform_0, window_bounds = array<i64: 16, 128>}, {pipeline_mode = #tpu.pipeline_mode<synchronous>, transform_indices = @transform_1, window_bounds = array<i64: 128, 256>}, {pipeline_mode = #tpu.pipeline_mode<synchronous>, transform_indices = @transform_2, window_bounds = array<i64: 1, 256>}, {transform_indices = @transform_3, window_bounds = array<i64: 16, 128>}]} {
    %c0 = arith.constant 0 : index
    %c0_0 = arith.constant 0 : index
    %0 = vector.load %arg1[%c0, %c0_0] : memref<16x128xf32, #tpu.memory_space<vmem>>, vector<16x128xf32>
    %c0_1 = arith.constant 0 : index
    %c0_2 = arith.constant 0 : index
    %1 = vector.load %arg2[%c0_1, %c0_2] : memref<128x256xf32, #tpu.memory_space<vmem>>, vector<128x256xf32>
    %cst = arith.constant dense<0.000000e+00> : vector<16x256xf32>
    %2 = tpu.matmul %0, %1, %cst {dimension_numbers = #tpu.dot_dimension_numbers<[1], [0], [0], [1], [0, 0, 1, 1], [], []>} : vector<16x128xf32>, vector<128x256xf32>, vector<16x256xf32> -> vector<16x256xf32>
    %c0_3 = arith.constant 0 : index
    %c0_4 = arith.constant 0 : index
    %3 = vector.load %arg3[%c0_3, %c0_4] : memref<1x256xf32, #tpu.memory_space<vmem>>, vector<1x256xf32>
    %4 = vector.broadcast %3 : vector<1x256xf32> to vector<16x256xf32>
    %5 = arith.addf %2, %4 : vector<16x256xf32>
    %6 = vector.extract_strided_slice %5 {offsets = [0, 0], sizes = [16, 128], strides = [1, 1]} : vector<16x256xf32> to vector<16x128xf32>
    %cst_5 = arith.constant 0.000000e+00 : f32
    %7 = vector.broadcast %cst_5 : f32 to vector<16x128xf32>
    %8 = arith.maximumf %6, %7 : vector<16x128xf32>
    %9 = vector.extract_strided_slice %5 {offsets = [0, 128], sizes = [16, 128], strides = [1, 1]} : vector<16x256xf32> to vector<16x128xf32>
    %10 = arith.negf %9 : vector<16x128xf32>
    %11 = math.exp %10 : vector<16x128xf32>
    %cst_6 = arith.constant 1.000000e+00 : f32
    %12 = vector.broadcast %cst_6 : f32 to vector<16x128xf32>
    %13 = arith.addf %12, %11 : vector<16x128xf32>
    %14 = arith.divf %12, %13 : vector<16x128xf32>
    %15 = arith.subf %8, %0 : vector<16x128xf32>
    %16 = arith.mulf %14, %15 : vector<16x128xf32>
    %17 = arith.addf %0, %16 : vector<16x128xf32>
    %c0_7 = arith.constant 0 : index
    %c0_8 = arith.constant 0 : index
    %18 = vector.load %arg4[%c0_7, %c0_8] : memref<16x128xf32, #tpu.memory_space<vmem>>, vector<16x128xf32>
    tpu.vector_store %arg4[%c0_7, %c0_8], %17 {strides = array<i32>} : memref<16x128xf32, #tpu.memory_space<vmem>>, vector<16x128xf32>,
    return
  }
  func.func @transform_0(%arg0: i32) -> (i32, i32) {
    %c0_i32 = arith.constant 0 : i32
    %c0_i32_0 = arith.constant 0 : i32
    return %arg0, %c0_i32 : i32, i32
  }
  func.func @transform_1(%arg0: i32) -> (i32, i32) {
    %c0_i32 = arith.constant 0 : i32
    %c0_i32_0 = arith.constant 0 : i32
    %c0_i32_1 = arith.constant 0 : i32
    return %c0_i32, %c0_i32_0 : i32, i32
  }
  func.func @transform_2(%arg0: i32) -> (i32, i32) {
    %c0_i32 = arith.constant 0 : i32
    %c0_i32_0 = arith.constant 0 : i32
    %c0_i32_1 = arith.constant 0 : i32
    return %c0_i32, %c0_i32_0 : i32, i32
  }
  func.func @transform_3(%arg0: i32) -> (i32, i32) {
    %c0_i32 = arith.constant 0 : i32
    %c0_i32_0 = arith.constant 0 : i32
    return %arg0, %c0_i32 : i32, i32
  }
}

</mosaic_0001>

<bundles_post_ra>
// kernel: tpu_custom_call.1
= control target key start
LH: loop header
LB: loop body
LE: loop exit
PB: predicated region body
PF: predicated region fallthrough
CT: control target
= control target key end

     0   :  { %8 = vsyncpa [#allocation3], 0  ;;  %s417_s0 = inlined_call_operand.hbm [shape: f32[16,128], index: 0, kind: input, shape index: {}]   ;;  %s418_s1 = inlined_call_operand.hbm [shape: f32[128,256], index: 1, kind: input, shape index: {}]   ;;  %s419_s2 = inlined_call_operand.vmem [shape: f32[1,256], index: 2, kind: input, shape index: {}]   ;;  %s420_s3 = inlined_call_operand.hbm [shape: f32[16,128], index: 3, kind: output, shape index: {}]  }
   0x1   :  { %9 = vsyncpa [#allocation6], 0 }
   0x2   :  { %10 = vsyncpa [#allocation4], 0  ;;  %s344_s12 = smov [#allocation2]   ;;  %s272_s16 = scalar_lea.hbm %s417_s0, 256 }
   0x3   :  { %s16_s13 = sshll.u32 %s344_s12, 4  ;;  %p273_p0 = scmp.ne.s32.totalorder %s417_s0, %s272_s16  ;;  %s17_s13 = int_to_ptr.vmem [resolvable:$true] %s16_s13 }
   0x4   :  { %p276_p1 = scmp.lt.u32.totalorder %s272_s16, %s417_s0 }
   0x6   :  { %p278_p2 = pnand %p276_p1, %p273_p0 }
   0x8   :  { %281 = shalt.err (!%p278_p2)
}
   0x9   :  { %s282_s21 = scalar_lea.vmem %s17_s13, 256  ;;  %p287_p4 = scmp.lt.s32.totalorder %s17_s13, %s17_s13 }
   0xa   :  { %p283_p3 = scmp.ne.s32.totalorder %s17_s13, %s282_s21  ;;  %p288_p5 = scmp.lt.s32.totalorder %s282_s21, %s282_s21 }
   0xc   :  { %p289_p6 = por %p288_p5, %p287_p4 }
   0xe   :  { %p290_p7 = pnand %p289_p6, %p283_p3 }
  0x10   :  { %293 = shalt.err (!%p290_p7)
}
  0x11   :  { %s345_s22 = smov 128   ;;  %s346_s23 = smov 8  }
  0x12   :  { %22 = dma.hbm_to_vmem [thread:$0]  %s417_s0, 256, %s17_s13, [#allocation3], %s345_s22, %s345_s22, %s346_s23  }
  0x13   :  { %s347_s26 = smov [#allocation5]   ;;  %s294_s30 = scalar_lea.hbm %s418_s1, 4096 }
  0x14   :  { %s28_s27 = sshll.u32 %s347_s26, 4  ;;  %p295_p8 = scmp.ne.s32.totalorder %s418_s1, %s294_s30  ;;  %s29_s27 = int_to_ptr.vmem [resolvable:$true] %s28_s27 }
  0x15   :  { %p298_p9 = scmp.lt.u32.totalorder %s294_s30, %s418_s1 }
  0x17   :  { %p300_p10 = pnand %p298_p9, %p295_p8 }
  0x19   :  { %303 = shalt.err (!%p300_p10)
}
  0x1a   :  { %s304_s8 = scalar_lea.vmem %s29_s27, 4096  ;;  %p309_p12 = scmp.lt.s32.totalorder %s29_s27, %s29_s27 }
  0x1b   :  { %p305_p11 = scmp.ne.s32.totalorder %s29_s27, %s304_s8  ;;  %p310_p13 = scmp.lt.s32.totalorder %s304_s8, %s304_s8 }
  0x1d   :  { %p311_p0 = por %p310_p13, %p309_p12 }
  0x1f   :  { %p312_p1 = pnand %p311_p0, %p305_p11 }
  0x21   :  { %315 = shalt.err (!%p312_p1)
}
  0x22   :  { %s348_s0 = smov 256   ;;  %s349_s9 = smov 16  }
  0x23   :  { %34 = dma.hbm_to_vmem [thread:$0]  %s418_s1, 4096, %s29_s27, [#allocation6], %s348_s0, %s348_s0, %s349_s9  }
  0x24   :  { %338 = dma.done.wait [#allocation3], 256  }
  0x25   :  { %339 = vsyncadd [#allocation3], 4294967040 }
  0x26   :  { %340 = dma.done.wait [#allocation6], 4096  }
  0x27   :  { %341 = vsyncadd [#allocation6], 4294963200  ;;  %v350_v0 = vmov 0.0   ;;  %v46_v1 = vld [vmem:[#allocation5 + $0x8] sm:$0xff]  ;;  %v48_v2 = vld [vmem:[#allocation5 + $0x18] sm:$0xff]  ;;  %v79_v51 = vlaneseq }
  0x28   :  { %153 = vmatprep.mubr.f32.mxu0 %v350_v0  ;;  %159 = vmatprep.mubr.f32.mxu1 %v350_v0  ;;  %v45_v3 = vld [vmem:[#allocation5] sm:$0xff]  ;;  %v208_v4 = vpack.c.bf16 %v48_v2, %v46_v1  ;;  %v47_v5 = vld [vmem:[#allocation5 + $0x10] sm:$0xff]  ;;  %v50_v6 = vld [vmem:[#allocation5 + $0x28] sm:$0xff] }
  0x29   :  { %v52_v7 = vld [vmem:[#allocation5 + $0x38] sm:$0xff]  ;;  %v210_v8 = vpack.c.bf16 %v47_v5, %v45_v3  ;;  %v49_v10 = vld [vmem:[#allocation5 + $0x20] sm:$0xff]  ;;  %v51_v11 = vld [vmem:[#allocation5 + $0x30] sm:$0xff]  ;;  %v80_v52 = vshrl.u32 %v79_v51, 7 }
  0x2a   :  { %v212_v9 = vpack.c.bf16 %v52_v7, %v50_v6  ;;  %v54_v12 = vld [vmem:[#allocation5 + $0x48] sm:$0xff]  ;;  %209 = vmatprep.subr.bf16.mxu0 %v208_v4  ;;  %240 = vmatprep.subr.bf16.mxu1 %v208_v4  ;;  %v56_v13 = vld [vmem:[#allocation5 + $0x58] sm:$0xff]  ;;  %v214_v14 = vpack.c.bf16 %v51_v11, %v49_v10  ;;  %v53_v16 = vld [vmem:[#allocation5 + $0x40] sm:$0xff] }
  0x2b   :  { %211 = vmatpush1.bf16.msra.mxu0 %v210_v8  ;;  %248 = vmatpush1.bf16.msra.mxu1 %v210_v8  ;;  %v216_v15 = vpack.c.bf16 %v56_v13, %v54_v12  ;;  %v55_v17 = vld [vmem:[#allocation5 + $0x50] sm:$0xff]  ;;  %v58_v18 = vld [vmem:[#allocation5 + $0x68] sm:$0xff]  ;;  %v60_v19 = vld [vmem:[#allocation5 + $0x78] sm:$0xff]  ;;  %v85_v53 = vsub.s32 1, %v80_v52  ;;  %v81_v0 = vsub.s32 0, %v80_v52 }
  0x2c   :  { %213 = vmatprep.subr.bf16.mxu0 %v212_v9  ;;  %241 = vmatprep.subr.bf16.mxu1 %v212_v9  ;;  %v218_v20 = vpack.c.bf16 %v55_v17, %v53_v16  ;;  %v220_v21 = vpack.c.bf16 %v60_v19, %v58_v18  ;;  %v57_v22 = vld [vmem:[#allocation5 + $0x60] sm:$0xff]  ;;  %v59_v23 = vld [vmem:[#allocation5 + $0x70] sm:$0xff]  ;;  %v62_v24 = vld [vmem:[#allocation5 + $0x88] sm:$0xff] }
  0x2d   :  { %v64_v25 = vld [vmem:[#allocation5 + $0x98] sm:$0xff]  ;;  %v222_v26 = vpack.c.bf16 %v59_v23, %v57_v22  ;;  %v61_v28 = vld [vmem:[#allocation5 + $0x80] sm:$0xff]  ;;  %v63_v29 = vld [vmem:[#allocation5 + $0x90] sm:$0xff] }
  0x2e   :  { %v224_v27 = vpack.c.bf16 %v64_v25, %v62_v24  ;;  %v66_v30 = vld [vmem:[#allocation5 + $0xa8] sm:$0xff]  ;;  %v68_v31 = vld [vmem:[#allocation5 + $0xb8] sm:$0xff]  ;;  %v226_v32 = vpack.c.bf16 %v63_v29, %v61_v28  ;;  %v65_v34 = vld [vmem:[#allocation5 + $0xa0] sm:$0xff] }
  0x2f   :  { %215 = vmatpush1.bf16.msra.mxu0 %v214_v14  ;;  %249 = vmatpush1.bf16.msra.mxu1 %v214_v14  ;;  %v228_v33 = vpack.c.bf16 %v68_v31, %v66_v30  ;;  %v67_v35 = vld [vmem:[#allocation5 + $0xb0] sm:$0xff]  ;;  %v70_v36 = vld [vmem:[#allocation5 + $0xc8] sm:$0xff]  ;;  %v72_v37 = vld [vmem:[#allocation5 + $0xd8] sm:$0xff] }
  0x30   :  { %217 = vmatprep.subr.bf16.mxu0 %v216_v15  ;;  %242 = vmatprep.subr.bf16.mxu1 %v216_v15  ;;  %v230_v38 = vpack.c.bf16 %v67_v35, %v65_v34  ;;  %v232_v39 = vpack.c.bf16 %v72_v37, %v70_v36  ;;  %v69_v40 = vld [vmem:[#allocation5 + $0xc0] sm:$0xff]  ;;  %v71_v41 = vld [vmem:[#allocation5 + $0xd0] sm:$0xff]  ;;  %v74_v42 = vld [vmem:[#allocation5 + $0xe8] sm:$0xff] }
  0x31   :  { %v76_v43 = vld [vmem:[#allocation5 + $0xf8] sm:$0xff]  ;;  %v234_v44 = vpack.c.bf16 %v71_v41, %v69_v40  ;;  %v73_v46 = vld [vmem:[#allocation5 + $0xe0] sm:$0xff]  ;;  %v75_v47 = vld [vmem:[#allocation5 + $0xf0] sm:$0xff] }
  0x32   :  { %v236_v45 = vpack.c.bf16 %v76_v43, %v74_v42  ;;  %v238_v48 = vpack.c.bf16 %v75_v47, %v73_v46  ;;  %v43_v49 = vld [vmem:[#allocation2] sm:$0xff]  ;;  %v44_v50 = vld [vmem:[#allocation2 + $0x8] sm:$0xff] }
  0x33   :  { %219 = vmatpush1.bf16.msra.mxu0 %v218_v20  ;;  %250 = vmatpush1.bf16.msra.mxu1 %v218_v20  ;;  %v77_v54 = vld [vmem:[%s419_s2] sm:$0x3]  ;;  %s351_s2 = smov [#allocation7]  }
  0x34   :  { %221 = vmatprep.subr.bf16.mxu0 %v220_v21  ;;  %243 = vmatprep.subr.bf16.mxu1 %v220_v21  ;;  %v86_v55 = vrot.slane %v77_v54, %v85_v53  ;;  %v82_v2 = vrot.slane %v77_v54, %v81_v0  ;;  %s193_s13 = sshll.u32 %s351_s2, 4  ;;  %s194_s13 = int_to_ptr.vmem [resolvable:$true] %s193_s13 }
  0x35   :  { %s316_s14 = scalar_lea.vmem %s194_s13, 256  ;;  %p321_p3 = scmp.lt.s32.totalorder %s194_s13, %s194_s13 }
  0x36   :  { %p317_p2 = scmp.ne.s32.totalorder %s194_s13, %s316_s14  ;;  %p322_p4 = scmp.lt.s32.totalorder %s316_s14, %s316_s14 }
  0x37   :  { %223 = vmatpush1.bf16.msra.mxu0 %v222_v26  ;;  %251 = vmatpush1.bf16.msra.mxu1 %v222_v26 }
  0x38   :  { %225 = vmatprep.subr.bf16.mxu0 %v224_v27  ;;  %244 = vmatprep.subr.bf16.mxu1 %v224_v27  ;;  %p323_p5 = por %p322_p4, %p321_p3 }
  0x3a   :  { %p324_p6 = pnand %p323_p5, %p317_p2 }
  0x3b   :  { %227 = vmatpush1.bf16.msra.mxu0 %v226_v32  ;;  %252 = vmatpush1.bf16.msra.mxu1 %v226_v32 }
  0x3c   :  { %229 = vmatprep.subr.bf16.mxu0 %v228_v33  ;;  %245 = vmatprep.subr.bf16.mxu1 %v228_v33 }
  0x3f   :  { %231 = vmatpush1.bf16.msra.mxu0 %v230_v38  ;;  %253 = vmatpush1.bf16.msra.mxu1 %v230_v38 }
  0x40   :  { %233 = vmatprep.subr.bf16.mxu0 %v232_v39  ;;  %246 = vmatprep.subr.bf16.mxu1 %v232_v39 }
  0x43   :  { %235 = vmatpush1.bf16.msra.mxu0 %v234_v44  ;;  %254 = vmatpush1.bf16.msra.mxu1 %v234_v44 }
  0x44   :  { %237 = vmatprep.subr.bf16.mxu0 %v236_v45  ;;  %247 = vmatprep.subr.bf16.mxu1 %v236_v45 }
  0x47   :  { %239 = vmatpush1.bf16.msra.mxu0 %v238_v48  ;;  %255 = vmatpush1.bf16.msra.mxu1 %v238_v48 }
  0x4a   :  { %154 = vmatmul.mubr.f32.vlgmr.msra.gmra.mrb[0].mxu0 %v43_v49  ;;  %160 = vmatmul.mubr.f32.vlgmr.msra.gmra.mrb[0].mxu1 %v44_v50 }
 0x11d   :  { %v155_v56 = vpop.f32.mrb[0].mxu0  ;;  %v161_v57 = vpop.f32.mrb[0].mxu1 }
 0x11e   :  { %v157_v58 = vpop.f32.mrb[1].mxu0  ;;  %v163_v59 = vpop.f32.mrb[1].mxu1  ;;  %v156_v6 = vadd.f32 %v155_v56, %v82_v2  ;;  %v162_v7 = vadd.f32 %v161_v57, %v82_v2 }
 0x11f   :  { %v158_v60 = vadd.f32 %v157_v58, %v86_v55  ;;  %v164_v61 = vadd.f32 %v163_v59, %v86_v55 }
 0x120   :  { %v166_v8 = vmax.f32 %v156_v6, 0.0  ;;  %v167_v9 = vmax.f32 %v162_v7, 0.0 }
 0x121   :  { %v206_v62 = vmul.f32 -1.442695, %v158_v60  ;;  %v207_v63 = vmul.f32 -1.442695, %v164_v61 }
 0x122   :  { %v180_v10 = vsub.f32 %v166_v8, %v43_v49  ;;  %v181_v12 = vsub.f32 %v167_v9, %v44_v50 }
 0x123   :  { %264 = vpow2.f32 %v206_v62 }
 0x124   :  { %266 = vpow2.f32 %v207_v63 }
 0x12d   :  { %v265_v1 = vpop.eup %264 }
 0x12e   :  { %v267_v3 = vpop.eup %266  ;;  %v174_v4 = vadd.f32 1.0, %v265_v1 }
 0x12f   :  { %v175_v5 = vadd.f32 1.0, %v267_v3 }
 0x130   :  { %268 = vrcp.f32 %v174_v4 }
 0x131   :  { %270 = vrcp.f32 %v175_v5 }
 0x13a   :  { %v269_v11 = vpop.eup %268 }
 0x13b   :  { %v271_v13 = vpop.eup %270  ;;  %v182_v14 = vmul.f32 %v269_v11, %v180_v10 }
 0x13c   :  { %v183_v15 = vmul.f32 %v271_v13, %v181_v12 }
 0x13d   :  { %v184_v16 = vadd.f32 %v182_v14, %v43_v49 }
 0x13e   :  { %v185_v17 = vadd.f32 %v183_v15, %v44_v50 }
 0x13f   :  { %186 = vst [vmem:[#allocation7] sm:$0xff] %v184_v16 }
 0x140   :  { %187 = vst [vmem:[#allocation7 + $0x8] sm:$0xff] %v185_v17 }
 0x141   :  { %327 = shalt.err (!%p324_p6)
}
 0x142   :  { %s328_s17 = scalar_lea.hbm %s420_s3, 256 }
 0x143   :  { %p329_p7 = scmp.ne.s32.totalorder %s420_s3, %s328_s17  ;;  %p332_p8 = scmp.lt.u32.totalorder %s328_s17, %s420_s3 }
 0x145   :  { %p334_p9 = pnand %p332_p8, %p329_p7 }
 0x147   :  { %337 = shalt.err (!%p334_p9)
}
 0x148   :  { %199 = dma.vmem_to_hbm [thread:$0]  %s194_s13, 256, %s420_s3, [#allocation4], %s345_s22, %s345_s22, %s346_s23  }
 0x149   :  { %342 = dma.done.wait [#allocation4], 256  }
 0x14a   :  { %343 = vsyncadd [#allocation4], 4294967040 }
 0x14b   :  { %203 = vsyncpa [#allocation3], 1 }
 0x14c   :  { %204 = vsyncpa [#allocation6], 1 }
 0x14d   :  { %205 = vsyncpa [#allocation4], 1 }

</bundles_post_ra>
